<compile_context>
chip_gen: v6e
topology: v6e:2x2x1
jax: 0.10.0
libtpu: 0.0.40
codegen_flags: <defaults>
</compile_context>

<pallas_src>
import numpy as np
import jax
import jax.numpy as jnp
from jax.experimental import pallas as pl
from jax.experimental.pallas import tpu as pltpu

TEMPERATURE = 0.3  # RelaxedOneHotCategorical temperature used in forward()


def _round_up(a, b):
    return ((a + b - 1) // b) * b


# ---------------------------------------------------------------------------
# Fused kernel:
#   h      = relu(fc1(x))
#   out    = out(h)                          probs = softmax(out)
#   av     = softmax((probs + gumbel)/0.3)   (RelaxedOneHotCategorical rsample;
#            probs are fed as "logits" exactly like the PyTorch module — softmax's
#            shift invariance makes this equivalent to torch's normalized form)
#   value  = out_value(relu(fc2_value(h)))
#   adv    = out_advantage(relu(h @ Wa[:H] + y @ Wa[H:] + ba))       per candidate
#   qsa    = (adv + value - mean_k(adv)) * (av0 if k < len_feature else av1)
#   output = one lane-dense slab  [ out(2) | av(2) | qsa(K) | zero pad ]
# ---------------------------------------------------------------------------
def _fused_kernel(lf_ref,                       # scalar prefetch: [len_feature]  (SMEM)
                  x_ref, g_ref, y_ref,          # activations: x (BN,H), gumbel (BN,2), y (BN*K,A)
                  wfc1_ref, bfc1_ref,           # fc1
                  wh_ref, bh_ref,               # packed [fc2_value | out | fc2_adv[:H]]
                  wab_ref,                      # fc2_advantage[H:]  (acts on y)
                  woutv_ref, boutv_ref,         # out_value      (1,H) / (1,1)
                  wouta_ref, bouta_ref,         # out_advantage  (1,H) / (1,1)
                  s_ref, st_ref, t_ref,         # 0/1 group-select / row-repeat / one-hot
                  eo_ref, ea_ref, eq_ref,       # 0/1 output-slab placement matrices
                  out_ref):                     # (BN, P) lane-dense output slab
    BN, H = x_ref.shape
    K = t_ref.shape[1]
    GH = _round_up(H, 128)                      # 128-aligned lane-group stride in wh/bh

    # ---- shared trunk: h = relu(fc1(x)) --------------------------------------------
    x = x_ref[...]
    h = jnp.maximum(
        jnp.dot(x, wfc1_ref[...], preferred_element_type=jnp.float32) + bfc1_ref[...],
        0.0)

    # ---- one lane-dense MXU pass over the packed h-consuming weights ----------------
    ho = jnp.dot(h, wh_ref[...], preferred_element_type=jnp.float32) + bh_ref[...]
    hv = jnp.maximum(ho[:, 0:H], 0.0)                 # relu(fc2_value(h))
    o = ho[:, GH:GH + 2]                              # out(h) logits            (BN, 2)
    adv_h = ho[:, GH + 128:GH + 128 + H]              # h-part of fc2_advantage (+ bias)

    # ---- value head ------------------------------------------------------------------
    value = jnp.sum(hv * woutv_ref[...], axis=-1, keepdims=True) + boutv_ref[...]  # (BN,1)

    # ---- softmax(out) -> relaxed one-hot sample (Gumbel-softmax) ---------------------
    m = jnp.max(o, axis=-1, keepdims=True)
    e = jnp.exp(o - m)
    probs = e * pl.reciprocal(jnp.sum(e, axis=-1, keepdims=True), approx=True)
    z = (probs + g_ref[...]) * (1.0 / TEMPERATURE)
    zm = jnp.max(z, axis=-1, keepdims=True)
    ze = jnp.exp(z - zm)
    av = ze * pl.reciprocal(jnp.sum(ze, axis=-1, keepdims=True), approx=True)       # (BN,2)

    # ---- advantage head:  [h ; y] @ Wa == h @ Wa[:H] + y @ Wa[H:] --------------------
    yp = jnp.dot(y_ref[...], wab_ref[...], preferred_element_type=jnp.float32)      # (BN*K,H)
    # "x.repeat(1, K, 1)" expressed as a 0/1 matmul (row-repeat), no reshape needed.
    adv_h_rep = jnp.dot(st_ref[...], adv_h, preferred_element_type=jnp.float32)     # (BN*K,H)
    pre = jnp.maximum(adv_h_rep + yp, 0.0)
    col_scores = jnp.sum(pre * wouta_ref[...], axis=-1, keepdims=True)               # (BN*K,1)
    # fold the per-candidate column back to (BN, K) with 0/1 matmuls (avoids a
    # sublane->lane reshape): adv[b,k] = col_scores[b*K+k]
    adv = (jnp.dot(s_ref[...], col_scores * t_ref[...],
                   preferred_element_type=jnp.float32)
           + bouta_ref[...])                                                         # (BN,K)

    # ---- dueling combine + relaxed-sample gating -------------------------------------
    # NOTE: the mean runs over all K slots including padded candidates — this mirrors
    # the PyTorch module exactly (it does not mask padding either).
    mean_adv = jnp.sum(adv, axis=-1, keepdims=True) * (1.0 / K)
    qsa = adv + value - mean_adv
    colv = jax.lax.broadcasted_iota(jnp.int32, (BN, K), 1)
    qsa = qsa * jnp.where(colv < lf_ref[0], av[:, 0:1], av[:, 1:2])

    # ---- pack [out | av | qsa | 0...] into a single lane-dense slab ------------------
    out_ref[...] = (jnp.dot(o, eo_ref[...], preferred_element_type=jnp.float32)
                    + jnp.dot(av, ea_ref[...], preferred_element_type=jnp.float32)
                    + jnp.dot(qsa, eq_ref[...], preferred_element_type=jnp.float32))


# ---------------------------------------------------------------------------
# pallas_call wrapper
# ---------------------------------------------------------------------------
def _fused_call(pp, x, gumbel, y_flat, len_feature, K):
    N, H = x.shape
    A = y_flat.shape[-1]

    # batch blocking: one block at small N; 8-row blocks (parallel over TCs on v7x) else.
    BN = N if N < 8 else 8
    Np = _round_up(N, BN)
    if Np != N:
        x = jnp.concatenate([x, jnp.zeros((Np - N, H), x.dtype)], axis=0)
        gumbel = jnp.concatenate([gumbel, jnp.zeros((Np - N, 2), gumbel.dtype)], axis=0)
        y_flat = jnp.concatenate(
            [y_flat, jnp.zeros(((Np - N) * K, A), y_flat.dtype)], axis=0)
    BNK = BN * K
    P = _round_up(4 + K, 128)            # lane-dense output slab width
    WP = pp["w_h"].shape[1]

    # 0/1 helper matrices (block-local, identical for every grid step): data movement
    # (row repeat, column fold, slab placement) expressed as MXU matmuls instead of
    # reshape/concatenate relayouts.
    S = np.zeros((BN, BNK), np.float32)      # S[b, b*K+k]   = 1   (group select)
    T = np.zeros((BNK, K), np.float32)       # T[b*K+k, k]   = 1   (within-group one-hot)
    for b in range(BN):
        for k in range(K):
            S[b, b * K + k] = 1.0
            T[b * K + k, k] = 1.0
    ST = np.ascontiguousarray(S.T)           # row-repeat ("x.repeat(1, K, 1)")
    Eo = np.zeros((2, P), np.float32); Eo[0, 0] = 1.0; Eo[1, 1] = 1.0     # out -> cols 0:2
    Ea = np.zeros((2, P), np.float32); Ea[0, 2] = 1.0; Ea[1, 3] = 1.0     # av  -> cols 2:4
    Eq = np.zeros((K, P), np.float32)
    Eq[np.arange(K), 4 + np.arange(K)] = 1.0                               # qsa -> cols 4:4+K

    lf = jnp.asarray([len_feature], jnp.int32)

    def _row(i, lf_ref):   # batch-blocked operands
        return (i, 0)

    def _fix(i, lf_ref):   # weights / constants (same block every step)
        return (0, 0)

    grid_spec = pltpu.PrefetchScalarGridSpec(
        num_scalar_prefetch=1,
        grid=(Np // BN,),
        in_specs=[
            pl.BlockSpec((BN, H), _row),        # x
            pl.BlockSpec((BN, 2), _row),        # gumbel
            pl.BlockSpec((BNK, A), _row),       # y (flattened batch-major)
            pl.BlockSpec((H, H), _fix),         # w_fc1
            pl.BlockSpec((1, H), _fix),         # b_fc1
            pl.BlockSpec((H, WP), _fix),        # packed [fc2_value | out | fc2_adv[:H]]
            pl.BlockSpec((1, WP), _fix),        # packed bias
            pl.BlockSpec((A, H), _fix),         # fc2_advantage[H:]
            pl.BlockSpec((1, H), _fix),         # out_value weight row
            pl.BlockSpec((1, 1), _fix),         # out_value bias
            pl.BlockSpec((1, H), _fix),         # out_advantage weight row
            pl.BlockSpec((1, 1), _fix),         # out_advantage bias
            pl.BlockSpec((BN, BNK), _fix),      # S
            pl.BlockSpec((BNK, BN), _fix),      # S^T
            pl.BlockSpec((BNK, K), _fix),       # T
            pl.BlockSpec((2, P), _fix),         # Eo
            pl.BlockSpec((2, P), _fix),         # Ea
            pl.BlockSpec((K, P), _fix),         # Eq
        ],
        out_specs=pl.BlockSpec((BN, P), _row),
    )

    slab = pl.pallas_call(
        _fused_kernel,
        grid_spec=grid_spec,
        out_shape=jax.ShapeDtypeStruct((Np, P), jnp.float32),
        compiler_params=pltpu.CompilerParams(
            dimension_semantics=("parallel",)),   # 2nd TC on v7x when batch grows
    )(lf, x, gumbel, y_flat,
      pp["w_fc1"], pp["b_fc1"], pp["w_h"], pp["b_h"], pp["wa_bot"],
      pp["w_outv_row"], pp["b_outv"], pp["w_outa_row"], pp["b_outa"],
      jnp.asarray(S), jnp.asarray(ST), jnp.asarray(T),
      jnp.asarray(Eo), jnp.asarray(Ea), jnp.asarray(Eq))

    slab = slab[:N]
    out = slab[:, 0:2]          # raw logits of self.out
    action_value_ = slab[:, 2:4]  # relaxed one-hot sample
    qsa = slab[:, 4:4 + K]
    return action_value_, qsa, out


# ---------------------------------------------------------------------------
# Parameters / glue
# ---------------------------------------------------------------------------
def init_params(key, hidden, act_size, entity, padding_id):
    ks = jax.random.split(key, 13)

    def nrm(k, shape, s=0.1):
        return jax.random.normal(k, shape, dtype=jnp.float32) * s

    emb = jax.random.normal(ks[0], (entity, act_size), dtype=jnp.float32)
    emb = emb.at[padding_id].set(0.0)            # nn.Embedding padding_idx row is zero
    return dict(
        embedding=emb,
        w_fc1=nrm(ks[1], (hidden, hidden)),          # fc1.weight.normal_(0, 0.1), [in,out]
        b_fc1=nrm(ks[2], (1, hidden)),
        w_out=nrm(ks[3], (hidden, 2)),               # out.weight.normal_(0, 0.1)
        b_out=nrm(ks[4], (1, 2)),
        w_fc2v=nrm(ks[5], (hidden, hidden)),
        b_fc2v=nrm(ks[6], (1, hidden)),
        w_outv_row=nrm(ks[7], (1, hidden)),          # out_value.weight as a row
        b_outv=nrm(ks[8], (1, 1)),
        w_fc2a=nrm(ks[9], (hidden + act_size, hidden)),
        b_fc2a=nrm(ks[10], (1, hidden)),
        w_outa_row=nrm(ks[11], (1, hidden)),         # out_advantage.weight as a row
        b_outa=nrm(ks[12], (1, 1)),
    )


def pack_params(params):
    """One-time packing of the three h-consuming weights into a lane-dense slab.

    Columns:  [0:H)        fc2_value
              [GH:GH+2)    out
              [GH+128:+H)  fc2_advantage[:H]   (GH = round_up(H,128); 128-aligned slices)
    """
    H = params["w_fc1"].shape[0]
    GH = _round_up(H, 128)
    WP = GH + 128 + GH
    w_h = jnp.zeros((H, WP), jnp.float32)
    w_h = w_h.at[:, 0:H].set(params["w_fc2v"])
    w_h = w_h.at[:, GH:GH + 2].set(params["w_out"])
    w_h = w_h.at[:, GH + 128:GH + 128 + H].set(params["w_fc2a"][:H, :])
    b_h = jnp.zeros((1, WP), jnp.float32)
    b_h = b_h.at[:, 0:H].set(params["b_fc2v"])
    b_h = b_h.at[:, GH:GH + 2].set(params["b_out"])
    b_h = b_h.at[:, GH + 128:GH + 128 + H].set(params["b_fc2a"])
    return dict(
        embedding=params["embedding"],
        w_fc1=params["w_fc1"], b_fc1=params["b_fc1"],
        w_h=w_h, b_h=b_h,
        wa_bot=params["w_fc2a"][H:, :],
        w_outv_row=params["w_outv_row"], b_outv=params["b_outv"],
        w_outa_row=params["w_outa_row"], b_outa=params["b_outa"],
    )


def padding(cand, padding_id):
    # mirrors State_Encoder.padding (ragged -> padded LongTensor).
    # NOTE: pad size depends on the input lists, so a new K retraces/recompiles the
    # kernel (inherent to the original module's dynamic padding).
    pad_size = max(len(c) for c in cand)
    out = np.full((len(cand), pad_size), padding_id, dtype=np.int32)
    for i, c in enumerate(cand):
        out[i, : len(c)] = np.asarray(c, dtype=np.int32)
    return jnp.asarray(out)


def state_encoder_forward(packed_params, state_emb_batch, scpr_emb, cand_item,
                          cand_feat, padding_id, rng_key):
    # TODO(synk): GraphEncoder (gcn_net) over a DGL hetero-graph is an external module
    # not defined in this file; `state_emb_batch` stands in for its output.
    N, L, _ = state_emb_batch.shape
    scpr_emb_batch = scpr_emb.reshape(N, L, -1)
    x = jnp.concatenate([scpr_emb_batch, state_emb_batch], axis=-1)      # [N, 1, H]
    H = x.shape[-1]

    # candidate padding + embedding lookup (tiny gather, kept in glue).
    feat_pad = padding(cand_feat, padding_id)
    item_pad = padding(cand_item, padding_id)
    cand_batch = jnp.concatenate([feat_pad, item_pad], axis=-1)          # [N, K]
    len_feature = feat_pad.shape[-1]
    K = cand_batch.shape[1]
    y_flat = jnp.take(packed_params["embedding"], cand_batch.reshape(-1), axis=0)  # [N*K, A]

    # Gumbel noise for RelaxedOneHotCategorical.rsample()
    u = jax.random.uniform(rng_key, (N, 2), dtype=jnp.float32,
                           minval=1e-10, maxval=1.0)
    gumbel = -jnp.log(-jnp.log(u))

    action_value_, qsa, out = _fused_call(
        packed_params, x.reshape(N, H), gumbel, y_flat, len_feature, K)

    # TODO(synk): choose_action=False branch (gather with up_limit on action_batch)
    # is not implemented; this reproduces the default choose_action=True path.
    return action_value_, qsa, out


if __name__ == "__main__":
    N, L = 2, 1
    hidden_size = 32
    emb_size = action_size = 8
    entity = 20
    padding_id = 0

    key = jax.random.PRNGKey(0)
    kp, k1, k2, kg = jax.random.split(key, 4)
    params = init_params(kp, hidden_size, emb_size, entity, padding_id)
    packed = pack_params(params)

    # gcn_net output (hidden-6 features) and scpr embedding (6 features)
    state_emb_batch = jax.random.normal(k1, (N, L, hidden_size - 6), dtype=jnp.float32)
    scpr_emb = jax.random.normal(k2, (N, L, 6), dtype=jnp.float32)
    cand_feat = [np.array([1, 2]), np.array([3, 4, 5])]                    # pads to 3
    cand_item = [np.array([6, 7, 8, 9]), np.array([10, 11, 12, 13, 14])]   # pads to 5

    action_value_, qsa, out = state_encoder_forward(
        packed, state_emb_batch, scpr_emb, cand_item, cand_feat, padding_id, kg)
    jax.block_until_ready((action_value_, qsa, out))

    K = max(len(c) for c in cand_feat) + max(len(c) for c in cand_item)
    assert action_value_.shape == (N, 2)
    assert out.shape == (N, 2)
    assert qsa.shape == (N, K)
    assert bool(jnp.all(jnp.isfinite(action_value_))
                & jnp.all(jnp.isfinite(qsa))
                & jnp.all(jnp.isfinite(out)))
    print("KERNEL_OK")
</pallas_src>

<mosaic_0001>
module attributes {stable_mosaic.version = 11 : i64} {
  func.func @_fused_kernel(%arg0: i32, %arg1: memref<1xi32, #tpu.memory_space<smem>>, %arg2: memref<2x32xf32, #tpu.memory_space<vmem>>, %arg3: memref<2x2xf32, #tpu.memory_space<vmem>>, %arg4: memref<16x8xf32, #tpu.memory_space<vmem>>, %arg5: memref<32x32xf32, #tpu.memory_space<vmem>>, %arg6: memref<1x32xf32, #tpu.memory_space<vmem>>, %arg7: memref<32x384xf32, #tpu.memory_space<vmem>>, %arg8: memref<1x384xf32, #tpu.memory_space<vmem>>, %arg9: memref<8x32xf32, #tpu.memory_space<vmem>>, %arg10: memref<1x32xf32, #tpu.memory_space<vmem>>, %arg11: memref<1x1xf32, #tpu.memory_space<vmem>>, %arg12: memref<1x32xf32, #tpu.memory_space<vmem>>, %arg13: memref<1x1xf32, #tpu.memory_space<vmem>>, %arg14: memref<2x16xf32, #tpu.memory_space<vmem>>, %arg15: memref<16x2xf32, #tpu.memory_space<vmem>>, %arg16: memref<16x8xf32, #tpu.memory_space<vmem>>, %arg17: memref<2x128xf32, #tpu.memory_space<vmem>>, %arg18: memref<2x128xf32, #tpu.memory_space<vmem>>, %arg19: memref<8x128xf32, #tpu.memory_space<vmem>>, %arg20: memref<2x128xf32, #tpu.memory_space<vmem>>) attributes {dimension_semantics = [#tpu.dimension_semantics<parallel>], iteration_bounds = array<i64: 1>, scalar_prefetch = 1 : i64, scratch_operands = 0 : i64, tpu.core_type = #tpu.core_type<tc>, window_params = [{transform_indices = @transform_0, window_bounds = array<i64: 2, 32>}, {transform_indices = @transform_1, window_bounds = array<i64: 2, 2>}, {transform_indices = @transform_2, window_bounds = array<i64: 16, 8>}, {pipeline_mode = #tpu.pipeline_mode<synchronous>, transform_indices = @transform_3, window_bounds = array<i64: 32, 32>}, {pipeline_mode = #tpu.pipeline_mode<synchronous>, transform_indices = @transform_4, window_bounds = array<i64: 1, 32>}, {pipeline_mode = #tpu.pipeline_mode<synchronous>, transform_indices = @transform_5, window_bounds = array<i64: 32, 384>}, {pipeline_mode = #tpu.pipeline_mode<synchronous>, transform_indices = @transform_6, window_bounds = array<i64: 1, 384>}, {pipeline_mode = #tpu.pipeline_mode<synchronous>, transform_indices = @transform_7, window_bounds = array<i64: 8, 32>}, {pipeline_mode = #tpu.pipeline_mode<synchronous>, transform_indices = @transform_8, window_bounds = array<i64: 1, 32>}, {pipeline_mode = #tpu.pipeline_mode<synchronous>, transform_indices = @transform_9, window_bounds = array<i64: 1, 1>}, {pipeline_mode = #tpu.pipeline_mode<synchronous>, transform_indices = @transform_10, window_bounds = array<i64: 1, 32>}, {pipeline_mode = #tpu.pipeline_mode<synchronous>, transform_indices = @transform_11, window_bounds = array<i64: 1, 1>}, {pipeline_mode = #tpu.pipeline_mode<synchronous>, transform_indices = @transform_12, window_bounds = array<i64: 2, 16>}, {pipeline_mode = #tpu.pipeline_mode<synchronous>, transform_indices = @transform_13, window_bounds = array<i64: 16, 2>}, {pipeline_mode = #tpu.pipeline_mode<synchronous>, transform_indices = @transform_14, window_bounds = array<i64: 16, 8>}, {pipeline_mode = #tpu.pipeline_mode<synchronous>, transform_indices = @transform_15, window_bounds = array<i64: 2, 128>}, {pipeline_mode = #tpu.pipeline_mode<synchronous>, transform_indices = @transform_16, window_bounds = array<i64: 2, 128>}, {pipeline_mode = #tpu.pipeline_mode<synchronous>, transform_indices = @transform_17, window_bounds = array<i64: 8, 128>}, {transform_indices = @transform_18, window_bounds = array<i64: 2, 128>}]} {
    %c0 = arith.constant 0 : index
    %c0_0 = arith.constant 0 : index
    %0 = vector.load %arg2[%c0, %c0_0] : memref<2x32xf32, #tpu.memory_space<vmem>>, vector<2x32xf32>
    %c0_1 = arith.constant 0 : index
    %c0_2 = arith.constant 0 : index
    %1 = vector.load %arg5[%c0_1, %c0_2] : memref<32x32xf32, #tpu.memory_space<vmem>>, vector<32x32xf32>
    %cst = arith.constant dense<0.000000e+00> : vector<2x32xf32>
    %2 = tpu.matmul %0, %1, %cst {dimension_numbers = #tpu.dot_dimension_numbers<[1], [0], [0], [1], [0, 0, 1, 1], [], []>} : vector<2x32xf32>, vector<32x32xf32>, vector<2x32xf32> -> vector<2x32xf32>
    %c0_3 = arith.constant 0 : index
    %c0_4 = arith.constant 0 : index
    %3 = vector.load %arg6[%c0_3, %c0_4] : memref<1x32xf32, #tpu.memory_space<vmem>>, vector<1x32xf32>
    %4 = vector.broadcast %3 : vector<1x32xf32> to vector<2x32xf32>
    %5 = arith.addf %2, %4 : vector<2x32xf32>
    %cst_5 = arith.constant 0.000000e+00 : f32
    %6 = vector.broadcast %cst_5 : f32 to vector<2x32xf32>
    %7 = arith.maximumf %5, %6 : vector<2x32xf32>
    %c0_6 = arith.constant 0 : index
    %c0_7 = arith.constant 0 : index
    %8 = vector.load %arg7[%c0_6, %c0_7] : memref<32x384xf32, #tpu.memory_space<vmem>>, vector<32x384xf32>
    %cst_8 = arith.constant dense<0.000000e+00> : vector<2x384xf32>
    %9 = tpu.matmul %7, %8, %cst_8 {dimension_numbers = #tpu.dot_dimension_numbers<[1], [0], [0], [1], [0, 0, 1, 1], [], []>} : vector<2x32xf32>, vector<32x384xf32>, vector<2x384xf32> -> vector<2x384xf32>
    %c0_9 = arith.constant 0 : index
    %c0_10 = arith.constant 0 : index
    %10 = vector.load %arg8[%c0_9, %c0_10] : memref<1x384xf32, #tpu.memory_space<vmem>>, vector<1x384xf32>
    %11 = vector.broadcast %10 : vector<1x384xf32> to vector<2x384xf32>
    %12 = arith.addf %9, %11 : vector<2x384xf32>
    %13 = vector.extract_strided_slice %12 {offsets = [0, 0], sizes = [2, 32], strides = [1, 1]} : vector<2x384xf32> to vector<2x32xf32>
    %cst_11 = arith.constant 0.000000e+00 : f32
    %14 = vector.broadcast %cst_11 : f32 to vector<2x32xf32>
    %15 = arith.maximumf %13, %14 : vector<2x32xf32>
    %16 = vector.extract_strided_slice %12 {offsets = [0, 128], sizes = [2, 2], strides = [1, 1]} : vector<2x384xf32> to vector<2x2xf32>
    %17 = vector.extract_strided_slice %12 {offsets = [0, 256], sizes = [2, 32], strides = [1, 1]} : vector<2x384xf32> to vector<2x32xf32>
    %c0_12 = arith.constant 0 : index
    %c0_13 = arith.constant 0 : index
    %18 = vector.load %arg10[%c0_12, %c0_13] : memref<1x32xf32, #tpu.memory_space<vmem>>, vector<1x32xf32>
    %19 = vector.broadcast %18 : vector<1x32xf32> to vector<2x32xf32>
    %20 = arith.mulf %15, %19 : vector<2x32xf32>
    %cst_14 = arith.constant dense<0.000000e+00> : vector<2xf32>
    %21 = vector.multi_reduction <add>, %20, %cst_14 [1] : vector<2x32xf32> to vector<2xf32>
    %22 = vector.shape_cast %21 : vector<2xf32> to vector<2x1xf32>
    %c0_15 = arith.constant 0 : index
    %c0_16 = arith.constant 0 : index
    %23 = vector.load %arg11[%c0_15, %c0_16] : memref<1x1xf32, #tpu.memory_space<vmem>>, vector<1x1xf32>
    %24 = vector.broadcast %23 : vector<1x1xf32> to vector<2x1xf32>
    %25 = arith.addf %22, %24 : vector<2x1xf32>
    %cst_17 = arith.constant dense<0xFF800000> : vector<2xf32>
    %26 = vector.multi_reduction <maximumf>, %16, %cst_17 [1] : vector<2x2xf32> to vector<2xf32>
    %27 = vector.shape_cast %26 : vector<2xf32> to vector<2x1xf32>
    %28 = vector.broadcast %27 : vector<2x1xf32> to vector<2x2xf32>
    %29 = arith.subf %16, %28 : vector<2x2xf32>
    %30 = math.exp %29 : vector<2x2xf32>
    %cst_18 = arith.constant dense<0.000000e+00> : vector<2xf32>
    %31 = vector.multi_reduction <add>, %30, %cst_18 [1] : vector<2x2xf32> to vector<2xf32>
    %32 = vector.shape_cast %31 : vector<2xf32> to vector<2x1xf32>
    %33 = tpu.reciprocal %32 {approx = true} : vector<2x1xf32> -> vector<2x1xf32>
    %34 = vector.broadcast %33 : vector<2x1xf32> to vector<2x2xf32>
    %35 = arith.mulf %30, %34 : vector<2x2xf32>
    %c0_19 = arith.constant 0 : index
    %c0_20 = arith.constant 0 : index
    %36 = vector.load %arg3[%c0_19, %c0_20] : memref<2x2xf32, #tpu.memory_space<vmem>>, vector<2x2xf32>
    %37 = arith.addf %35, %36 : vector<2x2xf32>
    %cst_21 = arith.constant 3.33333325 : f32
    %38 = vector.broadcast %cst_21 : f32 to vector<2x2xf32>
    %39 = arith.mulf %37, %38 : vector<2x2xf32>
    %cst_22 = arith.constant dense<0xFF800000> : vector<2xf32>
    %40 = vector.multi_reduction <maximumf>, %39, %cst_22 [1] : vector<2x2xf32> to vector<2xf32>
    %41 = vector.shape_cast %40 : vector<2xf32> to vector<2x1xf32>
    %42 = vector.broadcast %41 : vector<2x1xf32> to vector<2x2xf32>
    %43 = arith.subf %39, %42 : vector<2x2xf32>
    %44 = math.exp %43 : vector<2x2xf32>
    %cst_23 = arith.constant dense<0.000000e+00> : vector<2xf32>
    %45 = vector.multi_reduction <add>, %44, %cst_23 [1] : vector<2x2xf32> to vector<2xf32>
    %46 = vector.shape_cast %45 : vector<2xf32> to vector<2x1xf32>
    %47 = tpu.reciprocal %46 {approx = true} : vector<2x1xf32> -> vector<2x1xf32>
    %48 = vector.broadcast %47 : vector<2x1xf32> to vector<2x2xf32>
    %49 = arith.mulf %44, %48 : vector<2x2xf32>
    %c0_24 = arith.constant 0 : index
    %c0_25 = arith.constant 0 : index
    %50 = vector.load %arg4[%c0_24, %c0_25] : memref<16x8xf32, #tpu.memory_space<vmem>>, vector<16x8xf32>
    %c0_26 = arith.constant 0 : index
    %c0_27 = arith.constant 0 : index
    %51 = vector.load %arg9[%c0_26, %c0_27] : memref<8x32xf32, #tpu.memory_space<vmem>>, vector<8x32xf32>
    %cst_28 = arith.constant dense<0.000000e+00> : vector<16x32xf32>
    %52 = tpu.matmul %50, %51, %cst_28 {dimension_numbers = #tpu.dot_dimension_numbers<[1], [0], [0], [1], [0, 0, 1, 1], [], []>} : vector<16x8xf32>, vector<8x32xf32>, vector<16x32xf32> -> vector<16x32xf32>
    %c0_29 = arith.constant 0 : index
    %c0_30 = arith.constant 0 : index
    %53 = vector.load %arg15[%c0_29, %c0_30] : memref<16x2xf32, #tpu.memory_space<vmem>>, vector<16x2xf32>
    %cst_31 = arith.constant dense<0.000000e+00> : vector<16x32xf32>
    %54 = tpu.matmul %53, %17, %cst_31 {dimension_numbers = #tpu.dot_dimension_numbers<[1], [0], [0], [1], [0, 0, 1, 1], [], []>} : vector<16x2xf32>, vector<2x32xf32>, vector<16x32xf32> -> vector<16x32xf32>
    %55 = arith.addf %54, %52 : vector<16x32xf32>
    %cst_32 = arith.constant 0.000000e+00 : f32
    %56 = vector.broadcast %cst_32 : f32 to vector<16x32xf32>
    %57 = arith.maximumf %55, %56 : vector<16x32xf32>
    %c0_33 = arith.constant 0 : index
    %c0_34 = arith.constant 0 : index
    %58 = vector.load %arg12[%c0_33, %c0_34] : memref<1x32xf32, #tpu.memory_space<vmem>>, vector<1x32xf32>
    %59 = vector.broadcast %58 : vector<1x32xf32> to vector<16x32xf32>
    %60 = arith.mulf %57, %59 : vector<16x32xf32>
    %cst_35 = arith.constant dense<0.000000e+00> : vector<16xf32>
    %61 = vector.multi_reduction <add>, %60, %cst_35 [1] : vector<16x32xf32> to vector<16xf32>
    %62 = vector.shape_cast %61 : vector<16xf32> to vector<16x1xf32>
    %c0_36 = arith.constant 0 : index
    %c0_37 = arith.constant 0 : index
    %63 = vector.load %arg14[%c0_36, %c0_37] : memref<2x16xf32, #tpu.memory_space<vmem>>, vector<2x16xf32>
    %c0_38 = arith.constant 0 : index
    %c0_39 = arith.constant 0 : index
    %64 = vector.load %arg16[%c0_38, %c0_39] : memref<16x8xf32, #tpu.memory_space<vmem>>, vector<16x8xf32>
    %65 = vector.broadcast %62 : vector<16x1xf32> to vector<16x8xf32>
    %66 = arith.mulf %65, %64 : vector<16x8xf32>
    %cst_40 = arith.constant dense<0.000000e+00> : vector<2x8xf32>
    %67 = tpu.matmul %63, %66, %cst_40 {dimension_numbers = #tpu.dot_dimension_numbers<[1], [0], [0], [1], [0, 0, 1, 1], [], []>} : vector<2x16xf32>, vector<16x8xf32>, vector<2x8xf32> -> vector<2x8xf32>
    %c0_41 = arith.constant 0 : index
    %c0_42 = arith.constant 0 : index
    %68 = vector.load %arg13[%c0_41, %c0_42] : memref<1x1xf32, #tpu.memory_space<vmem>>, vector<1x1xf32>
    %69 = vector.broadcast %68 : vector<1x1xf32> to vector<2x8xf32>
    %70 = arith.addf %67, %69 : vector<2x8xf32>
    %cst_43 = arith.constant dense<0.000000e+00> : vector<2xf32>
    %71 = vector.multi_reduction <add>, %70, %cst_43 [1] : vector<2x8xf32> to vector<2xf32>
    %72 = vector.shape_cast %71 : vector<2xf32> to vector<2x1xf32>
    %cst_44 = arith.constant 1.250000e-01 : f32
    %73 = vector.broadcast %cst_44 : f32 to vector<2x1xf32>
    %74 = arith.mulf %72, %73 : vector<2x1xf32>
    %75 = vector.broadcast %25 : vector<2x1xf32> to vector<2x8xf32>
    %76 = arith.addf %70, %75 : vector<2x8xf32>
    %77 = vector.broadcast %74 : vector<2x1xf32> to vector<2x8xf32>
    %78 = arith.subf %76, %77 : vector<2x8xf32>
    %79 = tpu.iota {dimensions = array<i32: 1>} : vector<2x8xi32>
    %c0_45 = arith.constant 0 : index
    %80 = memref.load %arg1[%c0_45] : memref<1xi32, #tpu.memory_space<smem>>
    %81 = vector.broadcast %80 : i32 to vector<2x8xi32>
    %82 = arith.cmpi slt, %79, %81 : vector<2x8xi32>
    %83 = vector.extract_strided_slice %49 {offsets = [0, 0], sizes = [2, 1], strides = [1, 1]} : vector<2x2xf32> to vector<2x1xf32>
    %84 = vector.extract_strided_slice %49 {offsets = [0, 1], sizes = [2, 1], strides = [1, 1]} : vector<2x2xf32> to vector<2x1xf32>
    %85 = vector.shape_cast %83 : vector<2x1xf32> to vector<2x1xf32>
    %86 = vector.broadcast %85 : vector<2x1xf32> to vector<2x8xf32>
    %87 = vector.shape_cast %84 : vector<2x1xf32> to vector<2x1xf32>
    %88 = vector.broadcast %87 : vector<2x1xf32> to vector<2x8xf32>
    %89 = arith.select %82, %86, %88 : vector<2x8xi1>, vector<2x8xf32>
    %90 = arith.mulf %78, %89 : vector<2x8xf32>
    %c0_46 = arith.constant 0 : index
    %c0_47 = arith.constant 0 : index
    %91 = vector.load %arg17[%c0_46, %c0_47] : memref<2x128xf32, #tpu.memory_space<vmem>>, vector<2x128xf32>
    %cst_48 = arith.constant dense<0.000000e+00> : vector<2x128xf32>
    %92 = tpu.matmul %16, %91, %cst_48 {dimension_numbers = #tpu.dot_dimension_numbers<[1], [0], [0], [1], [0, 0, 1, 1], [], []>} : vector<2x2xf32>, vector<2x128xf32>, vector<2x128xf32> -> vector<2x128xf32>
    %c0_49 = arith.constant 0 : index
    %c0_50 = arith.constant 0 : index
    %93 = vector.load %arg18[%c0_49, %c0_50] : memref<2x128xf32, #tpu.memory_space<vmem>>, vector<2x128xf32>
    %cst_51 = arith.constant dense<0.000000e+00> : vector<2x128xf32>
    %94 = tpu.matmul %49, %93, %cst_51 {dimension_numbers = #tpu.dot_dimension_numbers<[1], [0], [0], [1], [0, 0, 1, 1], [], []>} : vector<2x2xf32>, vector<2x128xf32>, vector<2x128xf32> -> vector<2x128xf32>
    %95 = arith.addf %92, %94 : vector<2x128xf32>
    %c0_52 = arith.constant 0 : index
    %c0_53 = arith.constant 0 : index
    %96 = vector.load %arg19[%c0_52, %c0_53] : memref<8x128xf32, #tpu.memory_space<vmem>>, vector<8x128xf32>
    %cst_54 = arith.constant dense<0.000000e+00> : vector<2x128xf32>
    %97 = tpu.matmul %90, %96, %cst_54 {dimension_numbers = #tpu.dot_dimension_numbers<[1], [0], [0], [1], [0, 0, 1, 1], [], []>} : vector<2x8xf32>, vector<8x128xf32>, vector<2x128xf32> -> vector<2x128xf32>
    %98 = arith.addf %95, %97 : vector<2x128xf32>
    %c0_55 = arith.constant 0 : index
    %c0_56 = arith.constant 0 : index
    %99 = vector.load %arg20[%c0_55, %c0_56] : memref<2x128xf32, #tpu.memory_space<vmem>>, vector<2x128xf32>
    tpu.vector_store %arg20[%c0_55, %c0_56], %98 {strides = array<i32>} : memref<2x128xf32, #tpu.memory_space<vmem>>, vector<2x128xf32>,
    return
  }
  func.func @transform_0(%arg0: i32, %arg1: memref<1xi32, #tpu.memory_space<smem>>) -> (i32, i32) {
    %c0_i32 = arith.constant 0 : i32
    %c0_i32_0 = arith.constant 0 : i32
    return %arg0, %c0_i32 : i32, i32
  }
  func.func @transform_1(%arg0: i32, %arg1: memref<1xi32, #tpu.memory_space<smem>>) -> (i32, i32) {
    %c0_i32 = arith.constant 0 : i32
    %c0_i32_0 = arith.constant 0 : i32
    return %arg0, %c0_i32 : i32, i32
  }
  func.func @transform_2(%arg0: i32, %arg1: memref<1xi32, #tpu.memory_space<smem>>) -> (i32, i32) {
    %c0_i32 = arith.constant 0 : i32
    %c0_i32_0 = arith.constant 0 : i32
    return %arg0, %c0_i32 : i32, i32
  }
  func.func @transform_3(%arg0: i32, %arg1: memref<1xi32, #tpu.memory_space<smem>>) -> (i32, i32) {
    %c0_i32 = arith.constant 0 : i32
    %c0_i32_0 = arith.constant 0 : i32
    %c0_i32_1 = arith.constant 0 : i32
    return %c0_i32, %c0_i32_0 : i32, i32
  }
  func.func @transform_4(%arg0: i32, %arg1: memref<1xi32, #tpu.memory_space<smem>>) -> (i32, i32) {
    %c0_i32 = arith.constant 0 : i32
    %c0_i32_0 = arith.constant 0 : i32
    %c0_i32_1 = arith.constant 0 : i32
    return %c0_i32, %c0_i32_0 : i32, i32
  }
  func.func @transform_5(%arg0: i32, %arg1: memref<1xi32, #tpu.memory_space<smem>>) -> (i32, i32) {
    %c0_i32 = arith.constant 0 : i32
    %c0_i32_0 = arith.constant 0 : i32
    %c0_i32_1 = arith.constant 0 : i32
    return %c0_i32, %c0_i32_0 : i32, i32
  }
  func.func @transform_6(%arg0: i32, %arg1: memref<1xi32, #tpu.memory_space<smem>>) -> (i32, i32) {
    %c0_i32 = arith.constant 0 : i32
    %c0_i32_0 = arith.constant 0 : i32
    %c0_i32_1 = arith.constant 0 : i32
    return %c0_i32, %c0_i32_0 : i32, i32
  }
  func.func @transform_7(%arg0: i32, %arg1: memref<1xi32, #tpu.memory_space<smem>>) -> (i32, i32) {
    %c0_i32 = arith.constant 0 : i32
    %c0_i32_0 = arith.constant 0 : i32
    %c0_i32_1 = arith.constant 0 : i32
    return %c0_i32, %c0_i32_0 : i32, i32
  }
  func.func @transform_8(%arg0: i32, %arg1: memref<1xi32, #tpu.memory_space<smem>>) -> (i32, i32) {
    %c0_i32 = arith.constant 0 : i32
    %c0_i32_0 = arith.constant 0 : i32
    %c0_i32_1 = arith.constant 0 : i32
    return %c0_i32, %c0_i32_0 : i32, i32
  }
  func.func @transform_9(%arg0: i32, %arg1: memref<1xi32, #tpu.memory_space<smem>>) -> (i32, i32) {
    %c0_i32 = arith.constant 0 : i32
    %c0_i32_0 = arith.constant 0 : i32
    %c0_i32_1 = arith.constant 0 : i32
    return %c0_i32, %c0_i32_0 : i32, i32
  }
  func.func @transform_10(%arg0: i32, %arg1: memref<1xi32, #tpu.memory_space<smem>>) -> (i32, i32) {
    %c0_i32 = arith.constant 0 : i32
    %c0_i32_0 = arith.constant 0 : i32
    %c0_i32_1 = arith.constant 0 : i32
    return %c0_i32, %c0_i32_0 : i32, i32
  }
  func.func @transform_11(%arg0: i32, %arg1: memref<1xi32, #tpu.memory_space<smem>>) -> (i32, i32) {
    %c0_i32 = arith.constant 0 : i32
    %c0_i32_0 = arith.constant 0 : i32
    %c0_i32_1 = arith.constant 0 : i32
    return %c0_i32, %c0_i32_0 : i32, i32
  }
  func.func @transform_12(%arg0: i32, %arg1: memref<1xi32, #tpu.memory_space<smem>>) -> (i32, i32) {
    %c0_i32 = arith.constant 0 : i32
    %c0_i32_0 = arith.constant 0 : i32
    %c0_i32_1 = arith.constant 0 : i32
    return %c0_i32, %c0_i32_0 : i32, i32
  }
  func.func @transform_13(%arg0: i32, %arg1: memref<1xi32, #tpu.memory_space<smem>>) -> (i32, i32) {
    %c0_i32 = arith.constant 0 : i32
    %c0_i32_0 = arith.constant 0 : i32
    %c0_i32_1 = arith.constant 0 : i32
    return %c0_i32, %c0_i32_0 : i32, i32
  }
  func.func @transform_14(%arg0: i32, %arg1: memref<1xi32, #tpu.memory_space<smem>>) -> (i32, i32) {
    %c0_i32 = arith.constant 0 : i32
    %c0_i32_0 = arith.constant 0 : i32
    %c0_i32_1 = arith.constant 0 : i32
    return %c0_i32, %c0_i32_0 : i32, i32
  }
  func.func @transform_15(%arg0: i32, %arg1: memref<1xi32, #tpu.memory_space<smem>>) -> (i32, i32) {
    %c0_i32 = arith.constant 0 : i32
    %c0_i32_0 = arith.constant 0 : i32
    %c0_i32_1 = arith.constant 0 : i32
    return %c0_i32, %c0_i32_0 : i32, i32
  }
  func.func @transform_16(%arg0: i32, %arg1: memref<1xi32, #tpu.memory_space<smem>>) -> (i32, i32) {
    %c0_i32 = arith.constant 0 : i32
    %c0_i32_0 = arith.constant 0 : i32
    %c0_i32_1 = arith.constant 0 : i32
    return %c0_i32, %c0_i32_0 : i32, i32
  }
  func.func @transform_17(%arg0: i32, %arg1: memref<1xi32, #tpu.memory_space<smem>>) -> (i32, i32) {
    %c0_i32 = arith.constant 0 : i32
    %c0_i32_0 = arith.constant 0 : i32
    %c0_i32_1 = arith.constant 0 : i32
    return %c0_i32, %c0_i32_0 : i32, i32
  }
  func.func @transform_18(%arg0: i32, %arg1: memref<1xi32, #tpu.memory_space<smem>>) -> (i32, i32) {
    %c0_i32 = arith.constant 0 : i32
    %c0_i32_0 = arith.constant 0 : i32
    return %arg0, %c0_i32 : i32, i32
  }
}

</mosaic_0001>

<bundles_post_ra>
// kernel: tpu_custom_call.1
= control target key start
LH: loop header
LB: loop body
LE: loop exit
PB: predicated region body
PF: predicated region fallthrough
CT: control target
= control target key end

     0   :  { %s1371_s0 = inlined_call_operand.<no memory space> [shape: s32[1], index: 0, kind: input, shape index: {}]   ;;  %s1372_s1 = inlined_call_operand.vmem [shape: f32[2,32], index: 1, kind: input, shape index: {}]   ;;  %s1373_s2 = inlined_call_operand.vmem [shape: f32[2,2], index: 2, kind: input, shape index: {}]   ;;  %s1374_s3 = inlined_call_operand.vmem [shape: f32[16,8], index: 3, kind: input, shape index: {}]   ;;  %s1375_s4 = inlined_call_operand.vmem [shape: f32[32,32], index: 4, kind: input, shape index: {}]   ;;  %s1376_s5 = inlined_call_operand.hbm [shape: f32[1,32], index: 5, kind: input, shape index: {}]   ;;  %s1377_s6 = inlined_call_operand.hbm [shape: f32[32,384], index: 6, kind: input, shape index: {}]   ;;  %s1378_s7 = inlined_call_operand.vmem [shape: f32[1,384], index: 7, kind: input, shape index: {}]   ;;  %s1379_s8 = inlined_call_operand.vmem [shape: f32[8,32], index: 8, kind: input, shape index: {}]   ;;  %s1380_s9 = inlined_call_operand.vmem [shape: f32[1,32], index: 9, kind: input, shape index: {}]   ;;  %s1381_s10 = inlined_call_operand.<no memory space> [shape: f32[1,1], index: 10, kind: input, shape index: {}]   ;;  %s1382_s11 = inlined_call_operand.vmem [shape: f32[1,32], index: 11, kind: input, shape index: {}]   ;;  %s1383_s13 = inlined_call_operand.vmem [shape: f32[2,16], index: 13, kind: input, shape index: {}]   ;;  %s1384_s14 = inlined_call_operand.vmem [shape: f32[16,2], index: 14, kind: input, shape index: {}]   ;;  %s1385_s15 = inlined_call_operand.vmem [shape: f32[16,8], index: 15, kind: input, shape index: {}]   ;;  %s1386_s16 = inlined_call_operand.vmem [shape: f32[2,128], index: 16, kind: input, shape index: {}]   ;;  %s1387_s17 = inlined_call_operand.vmem [shape: f32[2,128], index: 17, kind: input, shape index: {}]   ;;  %s1388_s18 = inlined_call_operand.vmem [shape: f32[8,128], index: 18, kind: input, shape index: {}]   ;;  %s1389_s19 = inlined_call_operand.hbm [shape: f32[2,128], index: 19, kind: output, shape index: {}]   ;;  %s1390_s12 = inlined_call_operand.<no memory space> [shape: f32[1,1], index: 12, kind: input, shape index: {}]  }
   0x1   :  { %1392 = sst [smem:[#allocation15_spill]] %s1371_s0  ;;  %v25_v0 = vstv %s1381_s10  ;;  %v27_v1 = vstv %s1390_s12 }
   0x2   :  { %1393 = sst [smem:[#allocation16_spill]] %s1372_s1  ;;  %26 = vst [vmem:[#allocation4] sm:$0x1] %v25_v0  ;;  %28 = vst [vmem:[#allocation5] sm:$0x1] %v27_v1 }
   0x3   :  { %1394 = sst [smem:[#allocation17_spill]] %s1373_s2 }
   0x4   :  { %1395 = sst [smem:[#allocation18_spill]] %s1374_s3 }
   0x5   :  { %29 = vsyncpa [#allocation7], 0 }
   0x6   :  { %30 = vsyncpa [#allocation10], 0 }
   0x7   :  { %31 = vsyncpa [#allocation8], 0  ;;  %s1136_s1 = smov [#allocation6]   ;;  %s1137_s2 = smov [#allocation9]  }
   0x8   :  { %s46_s22 = sshll.u32 %s1136_s1, 4  ;;  %s55_s23 = sshll.u32 %s1137_s2, 4  ;;  %s47_s22 = int_to_ptr.vmem [resolvable:$true] %s46_s22  ;;  %s56_s23 = int_to_ptr.vmem [resolvable:$true] %s55_s23 }
   0x9   :  { %s1078_s24 = scalar_lea.vmem %s47_s22, 16  ;;  %s1082_s25 = scalar_lea.vmem %s47_s22, 32 }
   0xa   :  { %p1079_p0 = scmp.ne.s32.totalorder %s47_s22, %s1078_s24  ;;  %p1083_p1 = scmp.lt.s32.totalorder %s47_s22, %s47_s22 }
   0xb   :  { %p1084_p2 = scmp.lt.s32.totalorder %s1082_s25, %s1078_s24 }
   0xd   :  { %p1085_p3 = por %p1084_p2, %p1083_p1 }
   0xf   :  { %p1086_p4 = pnand %p1085_p3, %p1079_p0 }
  0x11   :  { %1089 = shalt.err (!%p1086_p4)
}
  0x12   :  { %49 = dma.hbm_to_vmem [thread:$0]  %s1376_s5, 16, %s47_s22, [#allocation7]  }
  0x13   :  { %s1098_s3 = scalar_lea.vmem %s56_s23, 1536  ;;  %p1103_p6 = scmp.lt.s32.totalorder %s56_s23, %s56_s23 }
  0x14   :  { %p1099_p5 = scmp.ne.s32.totalorder %s56_s23, %s1098_s3  ;;  %p1104_p7 = scmp.lt.s32.totalorder %s1098_s3, %s1098_s3 }
  0x16   :  { %p1105_p8 = por %p1104_p7, %p1103_p6 }
  0x18   :  { %p1106_p9 = pnand %p1105_p8, %p1099_p5 }
  0x1a   :  { %1109 = shalt.err (!%p1106_p9)
}
  0x1b   :  { %s1138_s26 = smov 384   ;;  %s1139_s27 = smov 24  }
  0x1c   :  { %61 = dma.hbm_to_vmem [thread:$0]  %s1377_s6, 1536, %s56_s23, [#allocation10], %s1138_s26, %s1138_s26, %s1139_s27  }
  0x1d   :  { %1130 = dma.done.wait [#allocation7], 16  }
  0x1e   :  { %1131 = vsyncadd [#allocation7], 4294967280 }
  0x1f   :  { %1132 = dma.done.wait [#allocation10], 1536  }
  0x20   :  { %1133 = vsyncadd [#allocation10], 4294965760  ;;  %v1140_v2 = vmov 0.0   ;;  %vm1141_vm0 = vmmov 0   ;;  %v96_v3 = vld [vmem:[%s1375_s4 + $0x18] sm:$0xff]  ;;  %v95_v4 = vld [vmem:[%s1375_s4 + $0x10] sm:$0xff]  ;;  %v193_v29 = vlaneseq }
  0x21   :  { %995 = vmatprep.subr.mxu0 %v1140_v2  ;;  %1003 = vmatprep.mubr.msk.f32.mxu0 %vm1141_vm0, %v1140_v2  ;;  %v189_v5 = vld [vmem:[#allocation9 + $0x50] sm:$0xff]  ;;  %v94_v6 = vld [vmem:[%s1375_s4 + $0x8] sm:$0xff]  ;;  %v186_v8 = vld [vmem:[#allocation9 + $0x38] sm:$0xff]  ;;  %s1396_s24 = sld [smem:[#allocation16_spill]]  ;;  %vm104_vm1 = vcmask 261120   ;;  %vm402_vm2 = vcmask 64512  }
  0x22   :  { %275 = vmatprep.mubr.f32.mxu1 %v1140_v2  ;;  %996 = vmatpush3.msra.mxu0 %v96_v3  ;;  %v188_v7 = vld [vmem:[#allocation9 + $0x48] sm:$0xff]  ;;  %v93_v9 = vld [vmem:[%s1375_s4] sm:$0xff]  ;;  %v185_v12 = vld [vmem:[#allocation9 + $0x30] sm:$0xff]  ;;  %s1397_s3 = sld [smem:[#allocation18_spill]]  ;;  %vm486_vm3 = vcmask 15360   ;;  %v194_v30 = vshrl.u32 %v193_v29, 7 }
  0x23   :  { %997 = vmatprep.subr.mxu0 %v1140_v2  ;;  %235 = vmatprep.subr.mxu1 %v189_v5  ;;  %v190_v11 = vld [vmem:[#allocation9 + $0x58] sm:$0xff]  ;;  %v187_v13 = vld [vmem:[#allocation9 + $0x40] sm:$0xff]  ;;  %v184_v16 = vld [vmem:[#allocation9 + $0x28] sm:$0xff]  ;;  %vm493_vm4 = vcmask 1041408   ;;  %vm373_vm5 = vcmask 9216   ;;  %vm361_vm6 = vcmask 254976  }
  0x24   :  { %998 = vmatpush3.msra.mxu0 %v95_v4  ;;  %236 = vmatpush1.msra.mxu1 %v188_v7  ;;  %v183_v14 = vld [vmem:[#allocation9 + $0x20] sm:$0xff]  ;;  %v182_v15 = vld [vmem:[#allocation9 + $0x18] sm:$0xff]  ;;  %v180_v17 = vld [vmem:[#allocation9 + $0x8] sm:$0xff]  ;;  %v203_v31 = vsub.s32 2, %v194_v30  ;;  %v199_v33 = vsub.s32 1, %v194_v30  ;;  %v195_v48 = vsub.s32 0, %v194_v30 }
  0x25   :  { %999 = vmatprep.subr.mxu0 %v1140_v2  ;;  %237 = vmatprep.subr.mxu1 %v186_v8  ;;  %v179_v18 = vld [vmem:[#allocation9] sm:$0xff]  ;;  %v181_v19 = vld [vmem:[#allocation9 + $0x10] sm:$0xff]  ;;  %v951_v21 = vld [vmem:[#allocation6] ss:$0 sm:$0xff]  ;;  %vm604_vm7 = vcmask 130048   ;;  %s1398_s4 = sld [smem:[#allocation17_spill]] }
  0x26   :  { %1000 = vmatpush3.msra.mxu0 %v94_v6  ;;  %238 = vmatpush1.msra.mxu1 %v185_v12  ;;  %v401_v20 = vld [vmem:[%s1379_s8] sm:$0xff]  ;;  %v485_v41 = vld [vmem:[%s1384_s14 + $0x8] sm:$0xff]  ;;  %v1142_v6 = vmov 0   ;;  %vm678_vm8 = vcmask 58368   ;;  %s1399_s8 = sld [smem:[#allocation15_spill]] }
  0x27   :  { %v92_v10 = vld [vmem:[%s1396_s24] sm:$0x3]  ;;  %1001 = vmatprep.subr.mxu0 %v1140_v2  ;;  %239 = vmatprep.subr.mxu1 %v183_v14  ;;  %v591_v7 = vld [vmem:[%s1385_s15 + $0x8] sm:$0xff] }
  0x28   :  { %1002 = vmatpush3.msra.mxu0 %v93_v9  ;;  %240 = vmatpush1.msra.mxu1 %v182_v15  ;;  %v399_v26 = vld [vmem:[%s1397_s3] sm:$0xff]  ;;  %v400_v27 = vld [vmem:[%s1397_s3 + $0x8] sm:$0xff] }
  0x29   :  { %1004 = vmatmul.mubr.msk.f32.vlgmr.msra.gmra.mxu0 %vm104_vm1, %v92_v10  ;;  %1006 = vmatprep.subr.mxu0 %v1140_v2  ;;  %v484_v28 = vld [vmem:[%s1384_s14] sm:$0xff] }
  0x2a   :  { %1007 = vmatpush3.msra.mxu0 %v190_v11  ;;  %1014 = vmatprep.mubr.msk.f32.mxu0 %vm1141_vm0, %v1140_v2  ;;  %v191_v32 = vld [vmem:[%s1378_s7] sm:$0x7] }
  0x2b   :  { %1008 = vmatprep.subr.mxu0 %v1140_v2  ;;  %241 = vmatprep.subr.mxu1 %v180_v17  ;;  %v204_v34 = vrot.slane %v191_v32, %v203_v31  ;;  %v200_v35 = vrot.slane %v191_v32, %v199_v33  ;;  %v196_v51 = vrot.slane %v191_v32, %v195_v48  ;;  %v962_v54 = vld [vmem:[%s1382_s11] ss:$0 sm:$0xff] }
  0x2c   :  { %1009 = vmatpush3.msra.mxu0 %v187_v13  ;;  %242 = vmatpush1.msra.mxu1 %v179_v18  ;;  %v955_v1 = vld [vmem:[%s1380_s9] ss:$0 sm:$0xff] }
  0x2d   :  { %1010 = vmatprep.subr.mxu0 %v1140_v2  ;;  %1017 = vmatprep.subr.mxu1 %v401_v20  ;;  %v590_v9 = vld [vmem:[%s1385_s15] sm:$0xff] }
  0x2e   :  { %1011 = vmatpush3.msra.mxu0 %v184_v16  ;;  %1058 = vset.pattern.permute.xlu0 %v1142_v6  ;;  %v589_v13 = vld [vmem:[%s1383_s13] sm:$0x3] }
  0x2f   :  { %1012 = vmatprep.subr.mxu0 %v1140_v2  ;;  %1059 = vset.pattern.permute.xlu1 %v1142_v6  ;;  %v706_v14 = vld [vmem:[%s1386_s16] sm:$0x3] }
  0x30   :  { %1013 = vmatpush3.msra.mxu0 %v181_v19  ;;  %v385_v17 = vld [vmem:[%s1398_s4] sm:$0x3] }
  0x31   :  { %1027 = vmatprep.subr.mxu0 %v1140_v2  ;;  %v707_v32 = vld [vmem:[%s1387_s17] sm:$0x3] }
  0xe9   :  { %v174_v22 = vpop.f32.mrf.mxu0 }
  0xea   :  { %v175_v23 = vadd.f32 %v951_v21, %v174_v22  ;;  %v963_v22 = vld [vmem:[#allocation5] ss:$0 sm:$0xff] }
  0xeb   :  { %v1005_v24 = vpop.f32.mrf.mxu0 }
  0xec   :  { %v178_v25 = vmax.f32 %v175_v23, 0.0 }
  0xee   :  { %953 = vmatmul.mubr.msk.f32.vlgmr.msra.gmra.mxu1 %vm104_vm1, %v178_v25  ;;  %1015 = vmatmul.mubr.msk.f32.vlgmr.msra.gmra.mxu0 %vm104_vm1, %v178_v25 }
  0xef   :  { %1018 = vmatpush3.msra.mxu1 %v401_v20  ;;  %1031 = vmatprep.mubr.msk.f32.mxu0 %vm1141_vm0, %v1140_v2 }
  0xf0   :  { %1019 = vmatprep.mubr.msk.f32.mxu1 %vm402_vm2, %v399_v26 }
  0xf2   :  { %1020 = vmatmul.mubr.msk.f32.vlgmr.msra.gmra.mxu1 %vm402_vm2, %v400_v27 }
  0xf3   :  { %1024 = vmatprep.mubr.msk.f32.mxu1 %vm486_vm3, %v484_v28  ;;  %v956_v28 = vld [vmem:[#allocation4] ss:$0 sm:$0xff] }
 0x1ae   :  { %v277_v36 = vpop.f32.mrf.mxu1  ;;  %v348_v37 = vpop.f32.mrf.mxu0 }
 0x1af   :  { %v349_v38 = vadd.f32 %v348_v37, %v204_v34  ;;  %v278_v57 = vadd.f32 %v277_v36, %v196_v51  ;;  %v1143_v37 = vmov 1  }
 0x1b0   :  { %v279_v39 = vpop.f32.mrf.mxu1  ;;  %v1016_v40 = vpop.f32.mrf.mxu0 }
 0x1b1   :  { %v280_v42 = vadd.f32 %v279_v39, %v200_v35  ;;  %1022 = vmatprep.subr.msk.mxu1 %vm493_vm4, %v349_v38  ;;  %v352_v62 = vmax.f32 %v278_v57, 0.0 }
 0x1b2   :  { %1023 = vmatpush3.msk.msra.mxu1 %vm493_vm4, %v349_v38  ;;  %v1021_v47 = vpop.f32.mrf.mxu1 }
 0x1b3   :  { %1025 = vmatmul.mubr.msk.f32.vlgmr.msra.gmra.mxu1 %vm486_vm3, %v485_v41  ;;  %v374_v43 = vsel %vm373_vm5, %v280_v42, -inf  ;;  %1034 = vmatprep.subr.mxu1 %v1140_v2  ;;  %v360_v4 = vmul.f32 %v955_v1, %v352_v62 }
 0x1b4   :  { %375 = vmax.xlane.f32.xlu0 %v374_v43  ;;  %1036 = vmatprep.mubr.msk.f32.mxu1 %vm1141_vm0, %v1140_v2  ;;  %v475_v49 = vpop.f32.mrf.mxu1 }
 0x1b5   :  { %v362_v5 = vsel %vm361_vm6, %v360_v4, 0.0  ;;  %1035 = vmatpush3.msk.msra.mxu1 %vm493_vm4, %v707_v32 }
 0x1b6   :  { %1044 = vmatprep.subr.mxu1 %v1140_v2 }
 0x23d   :  { %v376_v44 = vpop.xlane.xlu0 %375 }
 0x23e   :  { %v377_v45 = vsub.f32 %v280_v42, %v376_v44  ;;  %v859_v44 = vld [vmem:[%s1388_s18] sm:$0xff]  ;;  %s1144_s18 = smov [#allocation11]  }
 0x23f   :  { %s941_s26 = sshll.u32 %s1144_s18, 4  ;;  %s942_s26 = int_to_ptr.vmem [resolvable:$true] %s941_s26 }
 0x240   :  { %v378_v46 = vmul.f32 1.442695, %v377_v45  ;;  %s1110_s27 = scalar_lea.vmem %s942_s26, 32  ;;  %p1115_p11 = scmp.lt.s32.totalorder %s942_s26, %s942_s26 }
 0x241   :  { %p1111_p10 = scmp.ne.s32.totalorder %s942_s26, %s1110_s27  ;;  %p1116_p12 = scmp.lt.s32.totalorder %s1110_s27, %s1110_s27 }
 0x242   :  { %1062 = vpow2.f32 %v378_v46 }
 0x243   :  { %p1117_p13 = por %p1116_p12, %p1115_p11 }
 0x245   :  { %p1118_p0 = pnand %p1117_p13, %p1111_p10 }
 0x24f   :  { %v1063_v0 = vpop.eup %1062 }
 0x250   :  { %v380_v3 = vsel %vm373_vm5, %v1063_v0, 0.0 }
 0x273   :  { %v1026_v50 = vpop.f32.mrf.mxu1 }
 0x274   :  { %v569_v52 = vadd.f32 %v1026_v50, %v1021_v47  ;;  %v691_v47 = vand.u32 127, %v193_v29 }
 0x275   :  { %v563_v53 = vpop.f32.mrf.mxu1 }
 0x276   :  { %v573_v55 = vmax.f32 %v569_v52, 0.0  ;;  %v564_v56 = vadd.f32 %v563_v53, %v475_v49  ;;  %v693_v49 = vstv %s1399_s8 }
 0x277   :  { %vm694_vm9 = vcmp.lt.s32.totalorder %v691_v47, %v693_v49 }
 0x278   :  { %v572_v58 = vmax.f32 %v564_v56, 0.0  ;;  %v582_v59 = vmul.f32 %v962_v54, %v573_v55 }
 0x27a   :  { %v586_v60 = vsel %vm104_vm1, %v582_v59, 0.0  ;;  %v581_v61 = vmul.f32 %v962_v54, %v572_v58 }
 0x27b   :  { %587 = vadd.xlane.f32.xlu0 %v586_v60 }
 0x27c   :  { %v583_v63 = vsel %vm104_vm1, %v581_v61, 0.0 }
 0x27d   :  { %584 = vadd.xlane.f32.xlu1 %v583_v63 }
 0x281   :  { %381 = vadd.xlane.f32.xlu1 %v380_v3 }
 0x285   :  { %363 = vadd.xlane.f32.xlu1 %v362_v5 }
 0x304   :  { %v588_v8 = vpop.xlane.xlu0 %587 }
 0x305   :  { %v593_v10 = vmul.f32 %v591_v7, %v588_v8 }
 0x306   :  { %v585_v11 = vpop.xlane.xlu1 %584 }
 0x307   :  { %v592_v12 = vmul.f32 %v590_v9, %v585_v11  ;;  %1028 = vmatpush3.msra.mxu0 %v593_v10 }
 0x308   :  { %1029 = vmatprep.subr.mxu0 %v1140_v2 }
 0x309   :  { %1030 = vmatpush3.msra.mxu0 %v592_v12 }
 0x30a   :  { %1032 = vmatmul.mubr.msk.f32.vlgmr.msra.gmra.mxu0 %vm604_vm7, %v589_v13  ;;  %v382_v15 = vpop.xlane.xlu1 %381  ;;  %1039 = vmatprep.subr.mxu0 %v1140_v2 }
 0x30b   :  { %1064 = vrcp.f32 %v382_v15  ;;  %1040 = vmatpush3.msk.msra.mxu0 %vm493_vm4, %v706_v14  ;;  %1041 = vmatprep.mubr.msk.f32.mxu0 %vm1141_vm0, %v1140_v2 }
 0x30e   :  { %1042 = vmatmul.mubr.msk.f32.vlgmr.msra.gmra.mxu0 %vm486_vm3, %v280_v42  ;;  %v364_v30 = vpop.xlane.xlu1 %363 }
 0x30f   :  { %v372_v33 = vadd.f32 %v956_v28, %v364_v30 }
 0x318   :  { %v1065_v16 = vpop.eup %1064 }
 0x319   :  { %v384_v18 = vmul.f32 %v1065_v16, %v1063_v0 }
 0x31b   :  { %v386_v19 = vadd.f32 %v385_v17, %v384_v18 }
 0x31d   :  { %v387_v20 = vmul.f32 3.3333333, %v386_v19 }
 0x31f   :  { %v388_v21 = vsel %vm373_vm5, %v387_v20, -inf }
 0x320   :  { %389 = vmax.xlane.f32.xlu0 %v388_v21 }
 0x336   :  { %601 = vperm.xlu0 %1058, %v963_v22  }
 0x33a   :  { %1061 = vset.pattern.permute.xlu0 %v1143_v37 }
 0x3a9   :  { %v390_v23 = vpop.xlane.xlu0 %389 }
 0x3aa   :  { %v391_v24 = vsub.f32 %v387_v20, %v390_v23 }
 0x3ac   :  { %v392_v25 = vmul.f32 1.442695, %v391_v24 }
 0x3ae   :  { %1066 = vpow2.f32 %v392_v25 }
 0x3b1   :  { %v602_v38 = vpop.permute.xlu0 %601 }
 0x3bb   :  { %v1067_v26 = vpop.eup %1066 }
 0x3bc   :  { %v394_v27 = vsel %vm373_vm5, %v1067_v26, 0.0 }
 0x3bd   :  { %395 = vadd.xlane.f32.xlu1 %v394_v27 }
 0x3ca   :  { %v674_v31 = vpop.f32.mrf.mxu0 }
 0x3cb   :  { %v675_v39 = vadd.f32 %v674_v31, %v602_v38 }
 0x3cc   :  { %v1033_v34 = vpop.f32.mrf.mxu0 }
 0x3cd   :  { %v679_v40 = vsel %vm678_vm8, %v675_v39, 0.0 }
 0x3ce   :  { %685 = vperm.xlu1 %1059, %v372_v33   ;;  %v855_v35 = vpop.f32.mrf.mxu0 }
 0x3d0   :  { %v1043_v36 = vpop.f32.mrf.mxu0 }
 0x3f2   :  { %680 = vadd.xlane.f32.xlu1 %v679_v40 }
 0x446   :  { %v396_v41 = vpop.xlane.xlu1 %395 }
 0x447   :  { %1068 = vrcp.f32 %v396_v41 }
 0x44a   :  { %v686_v45 = vpop.permute.xlu1 %685 }
 0x44b   :  { %v688_v51 = vadd.f32 %v686_v45, %v675_v39 }
 0x454   :  { %v1069_v42 = vpop.eup %1068 }
 0x455   :  { %v398_v43 = vmul.f32 %v1069_v42, %v1067_v26 }
 0x457   :  { %1037 = vmatmul.mubr.msk.f32.vlgmr.msra.gmra.mxu1 %vm486_vm3, %v398_v43  ;;  %697 = vperm.xlu1 %1059, %v398_v43  }
 0x458   :  { %1046 = vmatprep.mubr.msk.f32.mxu1 %vm1141_vm0, %v1140_v2  ;;  %1045 = vmatpush3.msra.mxu1 %v859_v44 }
 0x45b   :  { %1060 = vset.pattern.permute.xlu1 %v1143_v37 }
 0x45c   :  { %701 = vperm.xlu1 %1060, %v398_v43  }
 0x47b   :  { %v681_v46 = vpop.xlane.xlu1 %680 }
 0x47c   :  { %v682_v50 = vmul.f32 0.125, %v681_v46 }
 0x47e   :  { %v689_v2 = vsub.f32 %v688_v51, %v682_v50 }
 0x4d2   :  { %v698_v48 = vpop.permute.xlu1 %697 }
 0x4d7   :  { %v702_v52 = vpop.permute.xlu1 %701 }
 0x4d8   :  { %v704_v53 = vsel %vm694_vm9, %v698_v48, %v702_v52 }
 0x4d9   :  { %v705_v54 = vmul.f32 %v704_v53, %v689_v2 }
 0x4db   :  { %1047 = vmatmul.mubr.msk.f32.vlgmr.msra.gmra.mxu1 %vm402_vm2, %v705_v54 }
 0x517   :  { %v779_v55 = vpop.f32.mrf.mxu1 }
 0x518   :  { %v856_v57 = vadd.f32 %v855_v35, %v779_v55 }
 0x519   :  { %v1038_v56 = vpop.f32.mrf.mxu1 }
 0x59b   :  { %v929_v29 = vpop.f32.mrf.mxu1 }
 0x59c   :  { %v933_v58 = vadd.f32 %v929_v29, %v856_v57 }
 0x59d   :  { %v1048_v59 = vpop.f32.mrf.mxu1 }
 0x59e   :  { %934 = vst [vmem:[#allocation11] sm:$0x3] %v933_v58 }
 0x59f   :  { %1121 = shalt.err (!%p1118_p0)
}
 0x5a0   :  { %944 = dma.vmem_to_hbm [thread:$0]  %s942_s26, 32, %s1389_s19, [#allocation8]  }
 0x5a1   :  { %1134 = dma.done.wait [#allocation8], 32  }
 0x5a2   :  { %1135 = vsyncadd [#allocation8], 4294967264 }
 0x5a3   :  { %948 = vsyncpa [#allocation7], 1 }
 0x5a4   :  { %949 = vsyncpa [#allocation10], 1 }
 0x5a5   :  { %950 = vsyncpa [#allocation8], 1 }

</bundles_post_ra>
